<compile_context>
chip_gen: v7x
topology: tpu7x:2x2x1
jax: 0.10.0
libtpu: 0.0.40
codegen_flags: <defaults>
</compile_context>

<pallas_src>
import numpy as np
import jax
import jax.numpy as jnp
from jax import lax
from jax.experimental import pallas as pl
from jax.experimental.pallas import tpu as pltpu


# ----------------------------------------------------------------------------
# Fused Pallas kernel: BN + conv1 + conv2 + fc1 + fc2 + fc3 (all ReLU'd)
# ----------------------------------------------------------------------------
def _dqn_fused_kernel(img_ref, d2_ref, gamma_ref, beta_ref,
                      m1_ref, b1_ref, w2_ref, b2_ref,
                      wf1_ref, bf1_ref, wf2_ref, bf2_ref, wf3_ref, bf3_ref,
                      o_ref):
    # BatchNorm2d(num_features=1), training statistics over the whole (1,1,H,W) image.
    img = img_ref[...]
    mean = jnp.mean(img)
    var = jnp.mean((img - mean) * (img - mean))
    scale = gamma_ref[0, 0] * lax.rsqrt(var + 1e-5)
    shift = beta_ref[0, 0] - mean * scale

    # conv1 + ReLU: BN affine applied pointwise to the pre-gathered patch matrix,
    # then one matmul against the packed conv1 weights.  rows = conv width q (padded
    # to 8), cols = (i, j, c, p) of the conv2 receptive field.
    d2 = d2_ref[...] * scale + shift                                             # (QP, U*U*P)
    g2 = jnp.maximum(
        jnp.dot(d2, m1_ref[...], preferred_element_type=jnp.float32) + b1_ref[...], 0.0)

    # conv2 + ReLU: cols = (oc, p) zero-padded to 128 lanes (lane-dense).
    y2 = jnp.maximum(
        jnp.dot(g2, w2_ref[...], preferred_element_type=jnp.float32) + b2_ref[...], 0.0)

    # fc1/fc2/fc3 + ReLU act on the conv width axis q == sublane axis of y2, so they
    # are plain left-matmuls; padded q rows are killed by zero columns in wf1.
    h1 = jnp.maximum(
        jnp.dot(wf1_ref[...], y2, preferred_element_type=jnp.float32) + bf1_ref[...], 0.0)
    h2 = jnp.maximum(
        jnp.dot(wf2_ref[...], h1, preferred_element_type=jnp.float32) + bf2_ref[...], 0.0)
    h3 = jnp.maximum(
        jnp.dot(wf3_ref[...], h2, preferred_element_type=jnp.float32) + bf3_ref[...], 0.0)
    o_ref[...] = h3.astype(o_ref.dtype)                                          # (A, 128)


def _full_spec(arr):
    return pl.BlockSpec(arr.shape, lambda i: (0, 0))


# ----------------------------------------------------------------------------
# One-time parameter packing (replaces per-call .T / im2col of weights)
# ----------------------------------------------------------------------------
def pack_dqn_params(params, *, H, W, k1, s1, k2, s2, lane_pad=128):
    w1 = np.asarray(params["conv1_w"], np.float32)          # (OC1, 1, k1, k1)
    b1 = np.asarray(params["conv1_b"], np.float32)
    w2 = np.asarray(params["conv2_w"], np.float32)          # (OC2, OC1, k2, k2)
    b2 = np.asarray(params["conv2_b"], np.float32)
    OC1, OC2 = w1.shape[0], w2.shape[0]
    assert w1.shape[1] == 1 and w2.shape[1] == OC1

    H1 = (H - k1) // s1 + 1                                  # conv1 output spatial
    P = (H1 - k2) // s2 + 1                                  # conv2 output spatial (== Q)
    U = s1 * (k2 - 1) + k1                                   # combined receptive-field extent
    step = s1 * s2
    QP = ((P + 7) // 8) * 8                                  # pad q (sublane) to multiple of 8

    NCOL = k2 * k2 * OC1 * P                                 # (i, j, c, p) columns
    MROW = U * U * P                                         # (u, v, p) patch rows

    m1 = np.zeros((MROW, NCOL), np.float32)
    b1row = np.zeros((1, NCOL), np.float32)
    for i in range(k2):
        for j in range(k2):
            for c in range(OC1):
                for p in range(P):
                    n = ((i * k2 + j) * OC1 + c) * P + p
                    b1row[0, n] = b1[c]
                    for a in range(k1):
                        for bb in range(k1):
                            u = s1 * i + a
                            v = s1 * j + bb
                            m = (u * U + v) * P + p
                            m1[m, n] = w1[c, 0, a, bb]

    MP = lane_pad
    assert OC2 * P <= MP
    w2big = np.zeros((NCOL, MP), np.float32)
    b2row = np.zeros((1, MP), np.float32)
    for oc in range(OC2):
        for p in range(P):
            col = oc * P + p
            b2row[0, col] = b2[oc]
            for i in range(k2):
                for j in range(k2):
                    for c in range(OC1):
                        n = ((i * k2 + j) * OC1 + c) * P + p
                        w2big[n, col] = w2[oc, c, i, j]

    fc1_w = np.asarray(params["fc1_w"], np.float32)          # (hidden, linear_input)
    assert fc1_w.shape[1] == P, "linear_input must equal conv2 output width"
    wf1 = np.zeros((fc1_w.shape[0], QP), np.float32)
    wf1[:, :P] = fc1_w                                       # zero cols kill padded q rows

    return dict(
        gamma=jnp.asarray(params["bn_gamma"], jnp.float32).reshape(1, 1),
        beta=jnp.asarray(params["bn_beta"], jnp.float32).reshape(1, 1),
        m1=jnp.asarray(m1), b1row=jnp.asarray(b1row),
        w2=jnp.asarray(w2big), b2row=jnp.asarray(b2row),
        wf1=jnp.asarray(wf1),
        bf1=jnp.asarray(params["fc1_b"], jnp.float32).reshape(-1, 1),
        wf2=jnp.asarray(params["fc2_w"], jnp.float32),
        bf2=jnp.asarray(params["fc2_b"], jnp.float32).reshape(-1, 1),
        wf3=jnp.asarray(params["fc3_w"], jnp.float32),
        bf3=jnp.asarray(params["fc3_b"], jnp.float32).reshape(-1, 1),
        geo=dict(H=H, W=W, P=P, U=U, step=step, QP=QP, OC2=OC2),
    )


def _build_patch_matrix(img, geo):
    # TODO(synk): this strided patch gather stays in XLA glue (tiny, ~5 KB); in-kernel
    # lane-strided slicing has no clean Mosaic lowering.
    P, U, step, QP = geo["P"], geo["U"], geo["step"], geo["QP"]
    span = step * (P - 1) + 1
    subs = []
    for u in range(U):
        for v in range(U):
            subs.append(img[u:u + span:step, v:v + span:step])   # (P, P) = [p, q]
    arr = jnp.stack(subs, axis=0)                                # (U*U, P, P) [(u,v), p, q]
    arr = jnp.transpose(arr, (2, 0, 1))                          # (P, U*U, P) [q, (u,v), p]
    d2 = arr.reshape(P, U * U * P)                               # [q, (u*U+v)*P + p]
    return jnp.pad(d2, ((0, QP - P), (0, 0)))                    # (QP, U*U*P)


# ----------------------------------------------------------------------------
# Forward pass (single fused pallas_call)
# ----------------------------------------------------------------------------
def dqn_forward(state, packed):
    geo = packed["geo"]
    assert state.shape[0] == 1, "BatchNorm2d(num_features=1) requires one input channel"
    img = state[0]                                               # (H, W)
    d2_raw = _build_patch_matrix(img, geo)

    ins = [img, d2_raw, packed["gamma"], packed["beta"],
           packed["m1"], packed["b1row"], packed["w2"], packed["b2row"],
           packed["wf1"], packed["bf1"], packed["wf2"], packed["bf2"],
           packed["wf3"], packed["bf3"]]
    A = packed["wf3"].shape[0]
    MP = packed["w2"].shape[1]

    out = pl.pallas_call(
        _dqn_fused_kernel,
        out_shape=jax.ShapeDtypeStruct((A, MP), jnp.float32),
        grid=(1,),
        in_specs=[_full_spec(a) for a in ins],
        out_specs=pl.BlockSpec((A, MP), lambda i: (0, 0)),
        compiler_params=pltpu.CompilerParams(dimension_semantics=("arbitrary",)),
    )(*ins)

    OC2, P = geo["OC2"], geo["P"]
    out = out[:, :OC2 * P]                                       # drop lane padding (A, OC2*P)
    return out.T.reshape(OC2, P, A)[None]                        # (1, OC2, P, A)


# ----------------------------------------------------------------------------
# Pure-JAX reference (correctness check)
# ----------------------------------------------------------------------------
def dqn_reference(state, params, stride, stride2):
    x = state[None]                                              # (1,1,H,W)
    mean = jnp.mean(x)
    var = jnp.mean((x - mean) ** 2)
    x = (x - mean) / jnp.sqrt(var + 1e-5) * params["bn_gamma"] + params["bn_beta"]

    dn = ("NCHW", "OIHW", "NCHW")
    x = jax.nn.relu(lax.conv_general_dilated(x, params["conv1_w"], (stride, stride),
                                             "VALID", dimension_numbers=dn)
                    + params["conv1_b"][None, :, None, None])
    x = jax.nn.relu(lax.conv_general_dilated(x, params["conv2_w"], (stride2, stride2),
                                             "VALID", dimension_numbers=dn)
                    + params["conv2_b"][None, :, None, None])
    x = jax.nn.relu(x @ params["fc1_w"].T + params["fc1_b"])
    x = jax.nn.relu(x @ params["fc2_w"].T + params["fc2_b"])
    x = jax.nn.relu(x @ params["fc3_w"].T + params["fc3_b"])
    return x


# ----------------------------------------------------------------------------
# Main
# ----------------------------------------------------------------------------
if __name__ == "__main__":
    # Hyperparameters consistent with the module's forward pass:
    #   state: (1, 16, 16); conv: 1->4, k=3, s=1; conv2: 4->8, k=3, s=2 -> (8, 6, 6)
    #   linear_input = 6; hidden = 32; hidden2 = 16; action_size = 4
    H = W = 16
    input_channels, output_channels, kernel_size, stride = 1, 4, 3, 1
    input_channels2, output_channels2, kernel_size2, stride2 = 4, 8, 3, 2
    linear_input, hidden_layer, hidden2_layer, action_size = 6, 32, 16, 4

    key = jax.random.PRNGKey(0)
    ks = jax.random.split(key, 9)

    def u(k, shape, scale=0.1):
        return jax.random.uniform(k, shape, jnp.float32, -scale, scale)

    params = {
        "bn_gamma": jnp.ones((1,), jnp.float32),
        "bn_beta": jnp.zeros((1,), jnp.float32),
        "conv1_w": u(ks[0], (output_channels, input_channels, kernel_size, kernel_size)),
        "conv1_b": u(ks[1], (output_channels,)),
        "conv2_w": u(ks[2], (output_channels2, input_channels2, kernel_size2, kernel_size2)),
        "conv2_b": u(ks[3], (output_channels2,)),
        "fc1_w": u(ks[4], (hidden_layer, linear_input)),
        "fc1_b": u(ks[5], (hidden_layer,)),
        "fc2_w": u(ks[6], (hidden2_layer, hidden_layer)),
        "fc2_b": u(ks[7], (hidden2_layer,)),
        "fc3_w": u(ks[8], (action_size, hidden2_layer)),
        "fc3_b": jnp.zeros((action_size,), jnp.float32),
    }

    state = jax.random.normal(jax.random.PRNGKey(1), (1, H, W), jnp.float32)

    packed = pack_dqn_params(params, H=H, W=W, k1=kernel_size, s1=stride,
                             k2=kernel_size2, s2=stride2)

    fwd = jax.jit(lambda s: dqn_forward(s, packed))
    out = jax.block_until_ready(fwd(state))

    ref = dqn_reference(state, params, stride, stride2)
    assert out.shape == (1, output_channels2, 6, action_size), out.shape
    err = float(jnp.max(jnp.abs(out - ref)))
    assert jnp.allclose(out, ref, atol=2e-4, rtol=2e-4), err

    print("KERNEL_OK")
</pallas_src>

<mosaic_0001>
module attributes {stable_mosaic.version = 11 : i64} {
  func.func @_dqn_fused_kernel(%arg0: i32, %arg1: memref<16x16xf32, #tpu.memory_space<vmem>>, %arg2: memref<8x150xf32, #tpu.memory_space<vmem>>, %arg3: memref<1x1xf32, #tpu.memory_space<vmem>>, %arg4: memref<1x1xf32, #tpu.memory_space<vmem>>, %arg5: memref<150x216xf32, #tpu.memory_space<vmem>>, %arg6: memref<1x216xf32, #tpu.memory_space<vmem>>, %arg7: memref<216x128xf32, #tpu.memory_space<vmem>>, %arg8: memref<1x128xf32, #tpu.memory_space<vmem>>, %arg9: memref<32x8xf32, #tpu.memory_space<vmem>>, %arg10: memref<32x1xf32, #tpu.memory_space<vmem>>, %arg11: memref<16x32xf32, #tpu.memory_space<vmem>>, %arg12: memref<16x1xf32, #tpu.memory_space<vmem>>, %arg13: memref<4x16xf32, #tpu.memory_space<vmem>>, %arg14: memref<4x1xf32, #tpu.memory_space<vmem>>, %arg15: memref<4x128xf32, #tpu.memory_space<vmem>>) attributes {dimension_semantics = [#tpu.dimension_semantics<arbitrary>], iteration_bounds = array<i64: 1>, scalar_prefetch = 0 : i64, scratch_operands = 0 : i64, tpu.core_type = #tpu.core_type<tc>, window_params = [{pipeline_mode = #tpu.pipeline_mode<synchronous>, transform_indices = @transform_0, window_bounds = array<i64: 16, 16>}, {pipeline_mode = #tpu.pipeline_mode<synchronous>, transform_indices = @transform_1, window_bounds = array<i64: 8, 150>}, {pipeline_mode = #tpu.pipeline_mode<synchronous>, transform_indices = @transform_2, window_bounds = array<i64: 1, 1>}, {pipeline_mode = #tpu.pipeline_mode<synchronous>, transform_indices = @transform_3, window_bounds = array<i64: 1, 1>}, {pipeline_mode = #tpu.pipeline_mode<synchronous>, transform_indices = @transform_4, window_bounds = array<i64: 150, 216>}, {pipeline_mode = #tpu.pipeline_mode<synchronous>, transform_indices = @transform_5, window_bounds = array<i64: 1, 216>}, {pipeline_mode = #tpu.pipeline_mode<synchronous>, transform_indices = @transform_6, window_bounds = array<i64: 216, 128>}, {pipeline_mode = #tpu.pipeline_mode<synchronous>, transform_indices = @transform_7, window_bounds = array<i64: 1, 128>}, {pipeline_mode = #tpu.pipeline_mode<synchronous>, transform_indices = @transform_8, window_bounds = array<i64: 32, 8>}, {pipeline_mode = #tpu.pipeline_mode<synchronous>, transform_indices = @transform_9, window_bounds = array<i64: 32, 1>}, {pipeline_mode = #tpu.pipeline_mode<synchronous>, transform_indices = @transform_10, window_bounds = array<i64: 16, 32>}, {pipeline_mode = #tpu.pipeline_mode<synchronous>, transform_indices = @transform_11, window_bounds = array<i64: 16, 1>}, {pipeline_mode = #tpu.pipeline_mode<synchronous>, transform_indices = @transform_12, window_bounds = array<i64: 4, 16>}, {pipeline_mode = #tpu.pipeline_mode<synchronous>, transform_indices = @transform_13, window_bounds = array<i64: 4, 1>}, {pipeline_mode = #tpu.pipeline_mode<synchronous>, transform_indices = @transform_14, window_bounds = array<i64: 4, 128>}]} {
    %c0 = arith.constant 0 : index
    %c0_0 = arith.constant 0 : index
    %0 = vector.load %arg1[%c0, %c0_0] : memref<16x16xf32, #tpu.memory_space<vmem>>, vector<16x16xf32>
    %1 = vector.shape_cast %0 : vector<16x16xf32> to vector<1x16x16xf32>
    %cst = arith.constant dense<0.000000e+00> : vector<1xf32>
    %2 = vector.multi_reduction <add>, %1, %cst [1, 2] : vector<1x16x16xf32> to vector<1xf32>
    %3 = vector.shape_cast %2 : vector<1xf32> to vector<1x1x1xf32>
    %4 = vector.extract %3[0, 0, 0] : f32 from vector<1x1x1xf32>
    %cst_1 = arith.constant 2.560000e+02 : f32
    %5 = arith.divf %4, %cst_1 : f32
    %6 = vector.broadcast %5 : f32 to vector<16x16xf32>
    %7 = arith.subf %0, %6 : vector<16x16xf32>
    %8 = vector.broadcast %5 : f32 to vector<16x16xf32>
    %9 = arith.subf %0, %8 : vector<16x16xf32>
    %10 = arith.mulf %7, %9 : vector<16x16xf32>
    %11 = vector.shape_cast %10 : vector<16x16xf32> to vector<1x16x16xf32>
    %cst_2 = arith.constant dense<0.000000e+00> : vector<1xf32>
    %12 = vector.multi_reduction <add>, %11, %cst_2 [1, 2] : vector<1x16x16xf32> to vector<1xf32>
    %13 = vector.shape_cast %12 : vector<1xf32> to vector<1x1x1xf32>
    %14 = vector.extract %13[0, 0, 0] : f32 from vector<1x1x1xf32>
    %cst_3 = arith.constant 2.560000e+02 : f32
    %15 = arith.divf %14, %cst_3 : f32
    %c0_4 = arith.constant 0 : index
    %c0_5 = arith.constant 0 : index
    %16 = vector.load %arg3[%c0_4, %c0_5] : memref<1x1xf32, #tpu.memory_space<vmem>>, vector<1x1xf32>
    %17 = vector.extract %16[0, 0] : f32 from vector<1x1xf32>
    %cst_6 = arith.constant 9.99999974E-6 : f32
    %18 = arith.addf %15, %cst_6 : f32
    %19 = math.rsqrt %18 : f32
    %20 = arith.mulf %17, %19 : f32
    %c0_7 = arith.constant 0 : index
    %c0_8 = arith.constant 0 : index
    %21 = vector.load %arg4[%c0_7, %c0_8] : memref<1x1xf32, #tpu.memory_space<vmem>>, vector<1x1xf32>
    %22 = vector.extract %21[0, 0] : f32 from vector<1x1xf32>
    %23 = arith.mulf %5, %20 : f32
    %24 = arith.subf %22, %23 : f32
    %c0_9 = arith.constant 0 : index
    %c0_10 = arith.constant 0 : index
    %25 = vector.load %arg2[%c0_9, %c0_10] : memref<8x150xf32, #tpu.memory_space<vmem>>, vector<8x150xf32>
    %26 = vector.broadcast %20 : f32 to vector<8x150xf32>
    %27 = arith.mulf %25, %26 : vector<8x150xf32>
    %28 = vector.broadcast %24 : f32 to vector<8x150xf32>
    %29 = arith.addf %27, %28 : vector<8x150xf32>
    %c0_11 = arith.constant 0 : index
    %c0_12 = arith.constant 0 : index
    %30 = vector.load %arg5[%c0_11, %c0_12] : memref<150x216xf32, #tpu.memory_space<vmem>>, vector<150x216xf32>
    %cst_13 = arith.constant dense<0.000000e+00> : vector<8x216xf32>
    %31 = tpu.matmul %29, %30, %cst_13 {dimension_numbers = #tpu.dot_dimension_numbers<[1], [0], [0], [1], [0, 0, 1, 1], [], []>} : vector<8x150xf32>, vector<150x216xf32>, vector<8x216xf32> -> vector<8x216xf32>
    %c0_14 = arith.constant 0 : index
    %c0_15 = arith.constant 0 : index
    %32 = vector.load %arg6[%c0_14, %c0_15] : memref<1x216xf32, #tpu.memory_space<vmem>>, vector<1x216xf32>
    %33 = vector.broadcast %32 : vector<1x216xf32> to vector<8x216xf32>
    %34 = arith.addf %31, %33 : vector<8x216xf32>
    %cst_16 = arith.constant 0.000000e+00 : f32
    %35 = vector.broadcast %cst_16 : f32 to vector<8x216xf32>
    %36 = arith.maximumf %34, %35 : vector<8x216xf32>
    %c0_17 = arith.constant 0 : index
    %c0_18 = arith.constant 0 : index
    %37 = vector.load %arg7[%c0_17, %c0_18] : memref<216x128xf32, #tpu.memory_space<vmem>>, vector<216x128xf32>
    %cst_19 = arith.constant dense<0.000000e+00> : vector<8x128xf32>
    %38 = tpu.matmul %36, %37, %cst_19 {dimension_numbers = #tpu.dot_dimension_numbers<[1], [0], [0], [1], [0, 0, 1, 1], [], []>} : vector<8x216xf32>, vector<216x128xf32>, vector<8x128xf32> -> vector<8x128xf32>
    %c0_20 = arith.constant 0 : index
    %c0_21 = arith.constant 0 : index
    %39 = vector.load %arg8[%c0_20, %c0_21] : memref<1x128xf32, #tpu.memory_space<vmem>>, vector<1x128xf32>
    %40 = vector.broadcast %39 : vector<1x128xf32> to vector<8x128xf32>
    %41 = arith.addf %38, %40 : vector<8x128xf32>
    %cst_22 = arith.constant 0.000000e+00 : f32
    %42 = vector.broadcast %cst_22 : f32 to vector<8x128xf32>
    %43 = arith.maximumf %41, %42 : vector<8x128xf32>
    %c0_23 = arith.constant 0 : index
    %c0_24 = arith.constant 0 : index
    %44 = vector.load %arg9[%c0_23, %c0_24] : memref<32x8xf32, #tpu.memory_space<vmem>>, vector<32x8xf32>
    %cst_25 = arith.constant dense<0.000000e+00> : vector<32x128xf32>
    %45 = tpu.matmul %44, %43, %cst_25 {dimension_numbers = #tpu.dot_dimension_numbers<[1], [0], [0], [1], [0, 0, 1, 1], [], []>} : vector<32x8xf32>, vector<8x128xf32>, vector<32x128xf32> -> vector<32x128xf32>
    %c0_26 = arith.constant 0 : index
    %c0_27 = arith.constant 0 : index
    %46 = vector.load %arg10[%c0_26, %c0_27] : memref<32x1xf32, #tpu.memory_space<vmem>>, vector<32x1xf32>
    %47 = vector.broadcast %46 : vector<32x1xf32> to vector<32x128xf32>
    %48 = arith.addf %45, %47 : vector<32x128xf32>
    %cst_28 = arith.constant 0.000000e+00 : f32
    %49 = vector.broadcast %cst_28 : f32 to vector<32x128xf32>
    %50 = arith.maximumf %48, %49 : vector<32x128xf32>
    %c0_29 = arith.constant 0 : index
    %c0_30 = arith.constant 0 : index
    %51 = vector.load %arg11[%c0_29, %c0_30] : memref<16x32xf32, #tpu.memory_space<vmem>>, vector<16x32xf32>
    %cst_31 = arith.constant dense<0.000000e+00> : vector<16x128xf32>
    %52 = tpu.matmul %51, %50, %cst_31 {dimension_numbers = #tpu.dot_dimension_numbers<[1], [0], [0], [1], [0, 0, 1, 1], [], []>} : vector<16x32xf32>, vector<32x128xf32>, vector<16x128xf32> -> vector<16x128xf32>
    %c0_32 = arith.constant 0 : index
    %c0_33 = arith.constant 0 : index
    %53 = vector.load %arg12[%c0_32, %c0_33] : memref<16x1xf32, #tpu.memory_space<vmem>>, vector<16x1xf32>
    %54 = vector.broadcast %53 : vector<16x1xf32> to vector<16x128xf32>
    %55 = arith.addf %52, %54 : vector<16x128xf32>
    %cst_34 = arith.constant 0.000000e+00 : f32
    %56 = vector.broadcast %cst_34 : f32 to vector<16x128xf32>
    %57 = arith.maximumf %55, %56 : vector<16x128xf32>
    %c0_35 = arith.constant 0 : index
    %c0_36 = arith.constant 0 : index
    %58 = vector.load %arg13[%c0_35, %c0_36] : memref<4x16xf32, #tpu.memory_space<vmem>>, vector<4x16xf32>
    %cst_37 = arith.constant dense<0.000000e+00> : vector<4x128xf32>
    %59 = tpu.matmul %58, %57, %cst_37 {dimension_numbers = #tpu.dot_dimension_numbers<[1], [0], [0], [1], [0, 0, 1, 1], [], []>} : vector<4x16xf32>, vector<16x128xf32>, vector<4x128xf32> -> vector<4x128xf32>
    %c0_38 = arith.constant 0 : index
    %c0_39 = arith.constant 0 : index
    %60 = vector.load %arg14[%c0_38, %c0_39] : memref<4x1xf32, #tpu.memory_space<vmem>>, vector<4x1xf32>
    %61 = vector.broadcast %60 : vector<4x1xf32> to vector<4x128xf32>
    %62 = arith.addf %59, %61 : vector<4x128xf32>
    %cst_40 = arith.constant 0.000000e+00 : f32
    %63 = vector.broadcast %cst_40 : f32 to vector<4x128xf32>
    %64 = arith.maximumf %62, %63 : vector<4x128xf32>
    %c0_41 = arith.constant 0 : index
    %c0_42 = arith.constant 0 : index
    %65 = vector.load %arg15[%c0_41, %c0_42] : memref<4x128xf32, #tpu.memory_space<vmem>>, vector<4x128xf32>
    tpu.vector_store %arg15[%c0_41, %c0_42], %64 {strides = array<i32>} : memref<4x128xf32, #tpu.memory_space<vmem>>, vector<4x128xf32>,
    return
  }
  func.func @transform_0(%arg0: i32) -> (i32, i32) {
    %c0_i32 = arith.constant 0 : i32
    %c0_i32_0 = arith.constant 0 : i32
    %c0_i32_1 = arith.constant 0 : i32
    return %c0_i32, %c0_i32_0 : i32, i32
  }
  func.func @transform_1(%arg0: i32) -> (i32, i32) {
    %c0_i32 = arith.constant 0 : i32
    %c0_i32_0 = arith.constant 0 : i32
    %c0_i32_1 = arith.constant 0 : i32
    return %c0_i32, %c0_i32_0 : i32, i32
  }
  func.func @transform_2(%arg0: i32) -> (i32, i32) {
    %c0_i32 = arith.constant 0 : i32
    %c0_i32_0 = arith.constant 0 : i32
    %c0_i32_1 = arith.constant 0 : i32
    return %c0_i32, %c0_i32_0 : i32, i32
  }
  func.func @transform_3(%arg0: i32) -> (i32, i32) {
    %c0_i32 = arith.constant 0 : i32
    %c0_i32_0 = arith.constant 0 : i32
    %c0_i32_1 = arith.constant 0 : i32
    return %c0_i32, %c0_i32_0 : i32, i32
  }
  func.func @transform_4(%arg0: i32) -> (i32, i32) {
    %c0_i32 = arith.constant 0 : i32
    %c0_i32_0 = arith.constant 0 : i32
    %c0_i32_1 = arith.constant 0 : i32
    return %c0_i32, %c0_i32_0 : i32, i32
  }
  func.func @transform_5(%arg0: i32) -> (i32, i32) {
    %c0_i32 = arith.constant 0 : i32
    %c0_i32_0 = arith.constant 0 : i32
    %c0_i32_1 = arith.constant 0 : i32
    return %c0_i32, %c0_i32_0 : i32, i32
  }
  func.func @transform_6(%arg0: i32) -> (i32, i32) {
    %c0_i32 = arith.constant 0 : i32
    %c0_i32_0 = arith.constant 0 : i32
    %c0_i32_1 = arith.constant 0 : i32
    return %c0_i32, %c0_i32_0 : i32, i32
  }
  func.func @transform_7(%arg0: i32) -> (i32, i32) {
    %c0_i32 = arith.constant 0 : i32
    %c0_i32_0 = arith.constant 0 : i32
    %c0_i32_1 = arith.constant 0 : i32
    return %c0_i32, %c0_i32_0 : i32, i32
  }
  func.func @transform_8(%arg0: i32) -> (i32, i32) {
    %c0_i32 = arith.constant 0 : i32
    %c0_i32_0 = arith.constant 0 : i32
    %c0_i32_1 = arith.constant 0 : i32
    return %c0_i32, %c0_i32_0 : i32, i32
  }
  func.func @transform_9(%arg0: i32) -> (i32, i32) {
    %c0_i32 = arith.constant 0 : i32
    %c0_i32_0 = arith.constant 0 : i32
    %c0_i32_1 = arith.constant 0 : i32
    return %c0_i32, %c0_i32_0 : i32, i32
  }
  func.func @transform_10(%arg0: i32) -> (i32, i32) {
    %c0_i32 = arith.constant 0 : i32
    %c0_i32_0 = arith.constant 0 : i32
    %c0_i32_1 = arith.constant 0 : i32
    return %c0_i32, %c0_i32_0 : i32, i32
  }
  func.func @transform_11(%arg0: i32) -> (i32, i32) {
    %c0_i32 = arith.constant 0 : i32
    %c0_i32_0 = arith.constant 0 : i32
    %c0_i32_1 = arith.constant 0 : i32
    return %c0_i32, %c0_i32_0 : i32, i32
  }
  func.func @transform_12(%arg0: i32) -> (i32, i32) {
    %c0_i32 = arith.constant 0 : i32
    %c0_i32_0 = arith.constant 0 : i32
    %c0_i32_1 = arith.constant 0 : i32
    return %c0_i32, %c0_i32_0 : i32, i32
  }
  func.func @transform_13(%arg0: i32) -> (i32, i32) {
    %c0_i32 = arith.constant 0 : i32
    %c0_i32_0 = arith.constant 0 : i32
    %c0_i32_1 = arith.constant 0 : i32
    return %c0_i32, %c0_i32_0 : i32, i32
  }
  func.func @transform_14(%arg0: i32) -> (i32, i32) {
    %c0_i32 = arith.constant 0 : i32
    %c0_i32_0 = arith.constant 0 : i32
    %c0_i32_1 = arith.constant 0 : i32
    return %c0_i32, %c0_i32_0 : i32, i32
  }
}

</mosaic_0001>

<bundles_post_ra>
// kernel: _lambda_.1
= control target key start
LH: loop header
LB: loop body
LE: loop exit
PB: predicated region body
PF: predicated region fallthrough
CT: control target
= control target key end

     0   :  { %vm53_vm0 = vcmask 130048   ;;  %vm162_vm1 = vcmask 1045504   ;;  %vm158_vm2 = vcmask 179200   ;;  %vm276_vm3 = vcmask 719872   ;;  %s1198_s0 = inlined_call_operand.vmem [shape: f32[16,16], index: 0, kind: input, shape index: {}]   ;;  %s1199_s2 = inlined_call_operand.<no memory space> [shape: f32[1,1], index: 2, kind: input, shape index: {}]   ;;  %s1200_s3 = inlined_call_operand.<no memory space> [shape: f32[1,1], index: 3, kind: input, shape index: {}]   ;;  %s1201_s4 = inlined_call_operand.vmem [shape: f32[150,216], index: 4, kind: input, shape index: {}]   ;;  %s1202_s6 = inlined_call_operand.vmem [shape: f32[216,128], index: 6, kind: input, shape index: {}]   ;;  %s1203_s1 = inlined_call_operand.vmem [shape: f32[8,150], index: 1, kind: input, shape index: {}]   ;;  %s1204_s5 = inlined_call_operand.vmem [shape: f32[1,216], index: 5, kind: input, shape index: {}]   ;;  %s1205_s8 = inlined_call_operand.vmem [shape: f32[32,8], index: 8, kind: input, shape index: {}]   ;;  %s1206_s9 = inlined_call_operand.vmem [shape: f32[32,1], index: 9, kind: input, shape index: {}]   ;;  %s1207_s11 = inlined_call_operand.vmem [shape: f32[16,1], index: 11, kind: input, shape index: {}]   ;;  %s1208_s13 = inlined_call_operand.vmem [shape: f32[4,1], index: 13, kind: input, shape index: {}]   ;;  %s1209_s7 = inlined_call_operand.vmem [shape: f32[1,128], index: 7, kind: input, shape index: {}]   ;;  %s1210_s10 = inlined_call_operand.vmem [shape: f32[16,32], index: 10, kind: input, shape index: {}]   ;;  %s1211_s12 = inlined_call_operand.vmem [shape: f32[4,16], index: 12, kind: input, shape index: {}]   ;;  %s1212_s14 = inlined_call_operand.vmem [shape: f32[4,128], index: 14, kind: output, shape index: {}]  }
   0x1   :  { %v51_v0 = vld [vmem:[%s1198_s0] sm:$0xff]  ;;  %v52_v1 = vld [vmem:[%s1198_s0 + $0x8] sm:$0xff]  ;;  %v19_v20 = vstv %s1199_s2  ;;  %v21_v21 = vstv %s1200_s3  ;;  %vm379_vm4 = vcmask 64512   ;;  %vm495_vm5 = vcmask 261120  }
   0x2   :  { %v54_v2 = vsel %vm53_vm0, %v51_v0, 0.0  ;;  %v55_v3 = vsel %vm53_vm0, %v52_v1, 0.0  ;;  %20 = vst [vmem:[#allocation2] sm:$0x1] %v19_v20  ;;  %22 = vst [vmem:[#allocation3] sm:$0x1] %v21_v21 }
   0x3   :  { %v56_v4 = vadd.f32 %v55_v3, %v54_v2  ;;  %v109_v22 = vld [vmem:[%s1201_s4 + $0x8] sm:$0xff]  ;;  %v111_v23 = vld [vmem:[%s1201_s4 + $0x18] sm:$0xff]  ;;  %v108_v24 = vld [vmem:[%s1201_s4] sm:$0xff]  ;;  %vm824_vm6 = vmmov 0  }
   0x4   :  { %v717_v25 = vpack.c.bf16 %v111_v23, %v109_v22  ;;  %v110_v26 = vld [vmem:[%s1201_s4 + $0x10] sm:$0xff]  ;;  %v113_v27 = vld [vmem:[%s1201_s4 + $0x28] sm:$0xff]  ;;  %v115_v29 = vld [vmem:[%s1201_s4 + $0x38] sm:$0xff]  ;;  %v821_v22 = vmov 0.0|0.0  }
   0x5   :  { %57 = vadd.xlane.f32.xlu0 %v56_v4  ;;  %v719_v28 = vpack.c.bf16 %v110_v26, %v108_v24  ;;  %v112_v30 = vld [vmem:[%s1201_s4 + $0x20] sm:$0xff]  ;;  %v114_v31 = vld [vmem:[%s1201_s4 + $0x30] sm:$0xff]  ;;  %v721_v32 = vpack.c.bf16 %v115_v29, %v113_v27  ;;  %v117_v33 = vld [vmem:[%s1201_s4 + $0x48] sm:$0xff]  ;;  %753 = vmatprep.subr.bf16.mxu1 %v821_v22 }
   0x6   :  { %718 = vmatprep.subr.bf16.mxu0 %v717_v25  ;;  %v119_v34 = vld [vmem:[%s1201_s4 + $0x58] sm:$0xff]  ;;  %v723_v35 = vpack.c.bf16 %v114_v31, %v112_v30  ;;  %v116_v37 = vld [vmem:[%s1201_s4 + $0x40] sm:$0xff]  ;;  %v118_v38 = vld [vmem:[%s1201_s4 + $0x50] sm:$0xff] }
   0x7   :  { %720 = vmatpush1.bf16.msra.mxu0 %v719_v28  ;;  %v725_v36 = vpack.c.bf16 %v119_v34, %v117_v33  ;;  %v121_v39 = vld [vmem:[%s1201_s4 + $0x68] sm:$0xff]  ;;  %v123_v40 = vld [vmem:[%s1201_s4 + $0x78] sm:$0xff]  ;;  %v727_v41 = vpack.c.bf16 %v118_v38, %v116_v37  ;;  %v120_v43 = vld [vmem:[%s1201_s4 + $0x60] sm:$0xff] }
   0x8   :  { %722 = vmatprep.subr.bf16.mxu0 %v721_v32  ;;  %v729_v42 = vpack.c.bf16 %v123_v40, %v121_v39  ;;  %v122_v44 = vld [vmem:[%s1201_s4 + $0x70] sm:$0xff]  ;;  %v125_v45 = vld [vmem:[%s1201_s4 + $0x88] sm:$0xff]  ;;  %v127_v46 = vld [vmem:[%s1201_s4 + $0x98] sm:$0xff] }
   0x9   :  { %v731_v47 = vpack.c.bf16 %v122_v44, %v120_v43  ;;  %v733_v48 = vpack.c.bf16 %v127_v46, %v125_v45  ;;  %v124_v49 = vld [vmem:[%s1201_s4 + $0x80] sm:$0xff]  ;;  %v126_v50 = vld [vmem:[%s1201_s4 + $0x90] sm:$0xff]  ;;  %v129_v51 = vld [vmem:[%s1201_s4 + $0xa8] sm:$0xff] }
   0xa   :  { %v131_v52 = vld [vmem:[%s1201_s4 + $0xb8] sm:$0xff]  ;;  %v735_v53 = vpack.c.bf16 %v126_v50, %v124_v49  ;;  %v128_v55 = vld [vmem:[%s1201_s4 + $0xa0] sm:$0xff]  ;;  %v130_v56 = vld [vmem:[%s1201_s4 + $0xb0] sm:$0xff] }
   0xb   :  { %724 = vmatpush1.bf16.msra.mxu0 %v723_v35  ;;  %v737_v54 = vpack.c.bf16 %v131_v52, %v129_v51  ;;  %v133_v57 = vld [vmem:[%s1201_s4 + $0xc8] sm:$0xff]  ;;  %v135_v58 = vld [vmem:[%s1201_s4 + $0xd8] sm:$0xff]  ;;  %v739_v59 = vpack.c.bf16 %v130_v56, %v128_v55  ;;  %v132_v61 = vld [vmem:[%s1201_s4 + $0xc0] sm:$0xff] }
   0xc   :  { %726 = vmatprep.subr.bf16.mxu0 %v725_v36  ;;  %v741_v60 = vpack.c.bf16 %v135_v58, %v133_v57  ;;  %v134_v62 = vld [vmem:[%s1201_s4 + $0xd0] sm:$0xff]  ;;  %v136_v3 = vld [vmem:[%s1201_s4 + $0xe0] sm:$0xff]  ;;  %v243_v24 = vld [vmem:[%s1202_s6 + $0x8] sm:$0xff] }
   0xd   :  { %v743_v63 = vpack.c.bf16 %v134_v62, %v132_v61  ;;  %v138_v4 = vld [vmem:[%s1201_s4 + $0xf0] sm:$0xff]  ;;  %v89_v21 = vld [vmem:[#allocation2] sm:$0x1]  ;;  %v245_v27 = vld [vmem:[%s1202_s6 + $0x18] sm:$0xff] }
   0xe   :  { %v242_v23 = vld [vmem:[%s1202_s6] sm:$0xff]  ;;  %v244_v25 = vld [vmem:[%s1202_s6 + $0x10] sm:$0xff]  ;;  %v247_v30 = vld [vmem:[%s1202_s6 + $0x28] sm:$0xff] }
   0xf   :  { %728 = vmatpush1.bf16.msra.mxu0 %v727_v41  ;;  %v754_v26 = vpack.c.bf16 %v243_v24, %v242_v23  ;;  %v757_v28 = vpack.c.bf16 %v245_v27, %v244_v25  ;;  %v246_v29 = vld [vmem:[%s1202_s6 + $0x20] sm:$0xff]  ;;  %v248_v32 = vld [vmem:[%s1202_s6 + $0x30] sm:$0xff]  ;;  %v249_v33 = vld [vmem:[%s1202_s6 + $0x38] sm:$0xff] }
  0x10   :  { %730 = vmatprep.subr.bf16.mxu0 %v729_v42  ;;  %v760_v31 = vpack.c.bf16 %v247_v30, %v246_v29  ;;  %v763_v34 = vpack.c.bf16 %v249_v33, %v248_v32  ;;  %v250_v35 = vld [vmem:[%s1202_s6 + $0x40] sm:$0xff]  ;;  %v251_v36 = vld [vmem:[%s1202_s6 + $0x48] sm:$0xff]  ;;  %v252_v38 = vld [vmem:[%s1202_s6 + $0x50] sm:$0xff] }
  0x11   :  { %755 = vmatpush1.bf16.msra.mxu1 %v754_v26  ;;  %v766_v37 = vpack.c.bf16 %v251_v36, %v250_v35  ;;  %v253_v39 = vld [vmem:[%s1202_s6 + $0x58] sm:$0xff]  ;;  %v254_v41 = vld [vmem:[%s1202_s6 + $0x60] sm:$0xff]  ;;  %v255_v42 = vld [vmem:[%s1202_s6 + $0x68] sm:$0xff]  ;;  %v823_v26 = vmov 0  }
  0x12   :  { %756 = vmatprep.subr.bf16.mxu1 %v821_v22  ;;  %v769_v40 = vpack.c.bf16 %v253_v39, %v252_v38  ;;  %v772_v43 = vpack.c.bf16 %v255_v42, %v254_v41  ;;  %v256_v44 = vld [vmem:[%s1202_s6 + $0x70] sm:$0xff]  ;;  %v257_v45 = vld [vmem:[%s1202_s6 + $0x78] sm:$0xff]  ;;  %v100_v62 = vld [vmem:[%s1203_s1] sm:$0xff]  ;;  %817 = vset.pattern.permute.xlu1 %v823_v26 }
  0x13   :  { %732 = vmatpush1.bf16.msra.mxu0 %v731_v47  ;;  %v775_v46 = vpack.c.bf16 %v257_v45, %v256_v44  ;;  %v258_v47 = vld [vmem:[%s1202_s6 + $0x80] sm:$0xff]  ;;  %v260_v50 = vld [vmem:[%s1202_s6 + $0x90] sm:$0xff]  ;;  %v261_v51 = vld [vmem:[%s1202_s6 + $0x98] sm:$0xff]  ;;  %818 = vset.pattern.permute.xlu0 %v823_v26 }
  0x14   :  { %734 = vmatprep.subr.bf16.mxu0 %v733_v48  ;;  %v259_v48 = vld [vmem:[%s1202_s6 + $0x88] sm:$0xff]  ;;  %v781_v52 = vpack.c.bf16 %v261_v51, %v260_v50  ;;  %v264_v56 = vld [vmem:[%s1202_s6 + $0xb0] sm:$0xff]  ;;  %v265_v57 = vld [vmem:[%s1202_s6 + $0xb8] sm:$0xff] }
  0x15   :  { %758 = vmatpush1.bf16.msra.mxu1 %v757_v28  ;;  %v778_v49 = vpack.c.bf16 %v259_v48, %v258_v47  ;;  %v787_v58 = vpack.c.bf16 %v265_v57, %v264_v56  ;;  %v351_v25 = vld [vmem:[%s1205_s8] sm:$0xff]  ;;  %v356_v28 = vld [vmem:[%s1206_s9 + $0x8] sm:$0xff]  ;;  %v357_v29 = vld [vmem:[%s1206_s9 + $0x10] sm:$0xff] }
  0x16   :  { %759 = vmatprep.subr.bf16.mxu1 %v821_v22  ;;  %v355_v27 = vld [vmem:[%s1206_s9] sm:$0xff]  ;;  %v358_v30 = vld [vmem:[%s1206_s9 + $0x18] sm:$0xff]  ;;  %v484_v32 = vld [vmem:[%s1207_s11 + $0x8] sm:$0xff] }
  0x17   :  { %736 = vmatpush1.bf16.msra.mxu0 %v735_v53  ;;  %v262_v53 = vld [vmem:[%s1202_s6 + $0xa0] sm:$0xff]  ;;  %361 = vperm.xlu1 %817, %v355_v27   ;;  %v352_v39 = vld [vmem:[%s1205_s8 + $0x8] sm:$0xff]  ;;  %v354_v41 = vld [vmem:[%s1205_s8 + $0x18] sm:$0xff] }
  0x18   :  { %738 = vmatprep.subr.bf16.mxu0 %v737_v54  ;;  %v263_v54 = vld [vmem:[%s1202_s6 + $0xa8] sm:$0xff]  ;;  %v580_v33 = vld [vmem:[%s1208_s13] sm:$0xf] }
  0x19   :  { %761 = vmatpush1.bf16.msra.mxu1 %v760_v31  ;;  %v784_v55 = vpack.c.bf16 %v263_v54, %v262_v53  ;;  %v483_v31 = vld [vmem:[%s1207_s11] sm:$0xff] }
  0x1a   :  { %762 = vmatprep.subr.bf16.mxu1 %v821_v22  ;;  %v481_v42 = vld [vmem:[%s1210_s10] sm:$0xff] }
  0x1b   :  { %740 = vmatpush1.bf16.msra.mxu0 %v739_v59  ;;  %366 = vperm.xlu1 %817, %v356_v28  }
  0x1c   :  { %742 = vmatprep.subr.bf16.mxu0 %v741_v60  ;;  %v96_v60 = vld [vmem:[#allocation3] sm:$0x1] }
  0x1d   :  { %764 = vmatpush1.bf16.msra.mxu1 %v763_v34  ;;  %v668_v34 = vld [vmem:[%s1209_s7] ss:$0 sm:$0xff] }
  0x1e   :  { %765 = vmatprep.subr.bf16.mxu1 %v821_v22 }
  0x1f   :  { %744 = vmatpush1.bf16.msra.mxu0 %v743_v63  ;;  %376 = vperm.xlu1 %817, %v358_v30  }
  0x21   :  { %767 = vmatpush1.bf16.msra.mxu1 %v766_v37 }
  0x22   :  { %768 = vmatprep.subr.bf16.mxu1 %v821_v22 }
  0x23   :  { %487 = vperm.xlu1 %817, %v483_v31  }
  0x25   :  { %770 = vmatpush1.bf16.msra.mxu1 %v769_v40  ;;  %v353_v40 = vld [vmem:[%s1205_s8 + $0x10] sm:$0xff] }
  0x26   :  { %771 = vmatprep.subr.bf16.mxu1 %v821_v22 }
  0x27   :  { %492 = vperm.xlu1 %817, %v484_v32  }
  0x29   :  { %773 = vmatpush1.bf16.msra.mxu1 %v772_v43 }
  0x2a   :  { %774 = vmatprep.subr.bf16.mxu1 %v821_v22 }
  0x2b   :  { %583 = vperm.xlu1 %817, %v580_v33  }
  0x2d   :  { %776 = vmatpush1.bf16.msra.mxu1 %v775_v46 }
  0x2e   :  { %777 = vmatprep.subr.bf16.mxu1 %v821_v22 }
  0x31   :  { %779 = vmatpush1.bf16.msra.mxu1 %v778_v49 }
  0x32   :  { %780 = vmatprep.subr.bf16.mxu1 %v821_v22 }
  0x35   :  { %782 = vmatpush1.bf16.msra.mxu1 %v781_v52 }
  0x36   :  { %783 = vmatprep.subr.bf16.mxu1 %v821_v22 }
  0x39   :  { %785 = vmatpush1.bf16.msra.mxu1 %v784_v55 }
  0x3a   :  { %786 = vmatprep.subr.bf16.mxu1 %v821_v22 }
  0x3d   :  { %788 = vmatpush1.bf16.msra.mxu1 %v787_v58 }
  0x3e   :  { %789 = vmatprep.subr.bf16.mxu1 %v821_v22 }
  0x92   :  { %v58_v5 = vpop.xlane.xlu0 %57 }
  0x93   :  { %v59_v6 = vrot.slane %v58_v5, 4 }
  0x95   :  { %v60_v7 = vadd.f32 %v59_v6, %v58_v5  ;;  %v747_v6 = vpack.c.bf16 %v138_v4, %v136_v3 }
  0x96   :  { %v362_v43 = vpop.permute.xlu1 %361 }
  0x97   :  { %v61_v8 = vrot.slane %v60_v7, 2 }
  0x99   :  { %v62_v9 = vadd.f32 %v61_v8, %v60_v7  ;;  %v141_v8 = vld [vmem:[%s1201_s4 + $0x108] sm:$0xff] }
  0x9a   :  { %v367_v44 = vpop.permute.xlu1 %366 }
  0x9b   :  { %v63_v10 = vrot.slane %v62_v9, 1 }
  0x9d   :  { %v64_v11 = vadd.f32 %v63_v10, %v62_v9  ;;  %v143_v9 = vld [vmem:[%s1201_s4 + $0x118] sm:$0xff] }
  0x9e   :  { %v377_v51 = vpop.permute.xlu1 %376 }
  0x9f   :  { %803 = vpush %v64_v11  ;;  %v749_v11 = vpack.c.bf16 %v143_v9, %v141_v8  ;;  %v268_v9 = vld [vmem:[%s1202_s6 + $0xd0] sm:$0xff] }
  0xd0   :  { %s908_s17 = spop %803 }
  0xd1   :  { %s68_s18 = smul.f32 0.00390625, %s908_s17 }
  0xd3   :  { %v69_v12 = vstv %s68_s18 }
  0xd4   :  { %v70_v13 = vsub.f32 %v51_v0, %v69_v12  ;;  %v71_v14 = vsub.f32 %v52_v1, %v69_v12  ;;  %v137_v0 = vld [vmem:[%s1201_s4 + $0xe8] sm:$0xff]  ;;  %v139_v1 = vld [vmem:[%s1201_s4 + $0xf8] sm:$0xff]  ;;  %v140_v12 = vld [vmem:[%s1201_s4 + $0x100] sm:$0xff] }
  0xd5   :  { %v745_v2 = vpack.c.bf16 %v139_v1, %v137_v0  ;;  %v101_v0 = vld [vmem:[%s1203_s1 + $0x8] sm:$0xff] }
  0xd6   :  { %v72_v15 = vmul.f32 %v70_v13, %v70_v13  ;;  %v73_v16 = vmul.f32 %v71_v14, %v71_v14  ;;  %v142_v13 = vld [vmem:[%s1201_s4 + $0x110] sm:$0xff] }
  0xd7   :  { %746 = vmatprep.subr.bf16.mxu0 %v745_v2  ;;  %v751_v14 = vpack.c.bf16 %v142_v13, %v140_v12 }
  0xd8   :  { %v74_v17 = vsel %vm53_vm0, %v72_v15, 0.0  ;;  %v75_v18 = vsel %vm53_vm0, %v73_v16, 0.0  ;;  %748 = vmatpush1.bf16.msra.mxu0 %v747_v6  ;;  %v266_v6 = vld [vmem:[%s1202_s6 + $0xc0] sm:$0xff] }
  0xd9   :  { %v76_v19 = vadd.f32 %v75_v18, %v74_v17  ;;  %750 = vmatprep.subr.bf16.mxu0 %v749_v11  ;;  %v145_v17 = vld [vmem:[%s1201_s4 + $0x128] sm:$0x3f]  ;;  %v144_v18 = vld [vmem:[%s1201_s4 + $0x120] sm:$0x3f]  ;;  %v148_v11 = vlaneseq }
  0xdb   :  { %77 = vadd.xlane.f32.xlu0 %v76_v19  ;;  %v149_v12 = vshrl.u32 %v148_v11, 7 }
  0xdc   :  { %752 = vmatpush1.bf16.msra.mxu0 %v751_v14  ;;  %v146_v14 = vld [vmem:[%s1204_s5] sm:$0x3] }
  0xdd   :  { %665 = vmatprep.subr.msk.mxu0 %vm162_vm1, %v145_v17  ;;  %v150_v13 = vsub.s32 0, %v149_v12 }
  0xe0   :  { %666 = vmatpush1.msk.msra.mxu0 %vm162_vm1, %v144_v18 }
  0xf1   :  { %371 = vperm.xlu0 %818, %v357_v29  }
 0x168   :  { %v78_v5 = vpop.xlane.xlu0 %77 }
 0x169   :  { %v79_v7 = vrot.slane %v78_v5, 4 }
 0x16b   :  { %v80_v10 = vadd.f32 %v79_v7, %v78_v5  ;;  %v267_v7 = vld [vmem:[%s1202_s6 + $0xc8] sm:$0xff] }
 0x16c   :  { %v790_v8 = vpack.c.bf16 %v267_v7, %v266_v6  ;;  %v579_v7 = vld [vmem:[%s1211_s12] sm:$0xf] }
 0x16d   :  { %v81_v15 = vrot.slane %v80_v10, 2 }
 0x16e   :  { %791 = vmatpush1.bf16.msra.mxu1 %v790_v8 }
 0x16f   :  { %v82_v16 = vadd.f32 %v81_v15, %v80_v10  ;;  %v822_v10 = vmov 0.0   ;;  %v154_v15 = vsub.s32 1, %v149_v12 }
 0x170   :  { %332 = vmatprep.subr.mxu1 %v822_v10  ;;  %v372_v50 = vpop.permute.xlu0 %371 }
 0x171   :  { %v83_v19 = vrot.slane %v82_v16, 1  ;;  %v155_v17 = vrot.slane %v146_v14, %v154_v15 }
 0x172   :  { %333 = vmatpush1.msra.mxu1 %v268_v9 }
 0x173   :  { %v84_v20 = vadd.f32 %v83_v19, %v82_v16  ;;  %v151_v16 = vrot.slane %v146_v14, %v150_v13 }
 0x175   :  { %805 = vpush %v84_v20 }
 0x176   :  { %807 = vpush %v89_v21 }
 0x1a6   :  { %s806_s24 = spop %805 }
 0x1a7   :  { %s88_s25 = smul.f32 0.00390625, %s806_s24  ;;  %s808_s27 = spop %807 }
 0x1a9   :  { %s91_s26 = sadd.f32 1e-05, %s88_s25 }
 0x1ab   :  { %v92_v59 = vstv %s91_s26 }
 0x1ac   :  { %819 = vrsqrt.f32 %v92_v59 }
 0x1b6   :  { %v820_v61 = vpop.eup %819 }
 0x1b7   :  { %809 = vpush %v820_v61  ;;  %v482_v61 = vld [vmem:[%s1210_s10 + $0x8] sm:$0xff] }
 0x1b8   :  { %811 = vpush %v96_v60 }
 0x1e8   :  { %s810_s2 = spop %809 }
 0x1e9   :  { %s95_s28 = smul.f32 %s810_s2, %s808_s27  ;;  %s812_s29 = spop %811 }
 0x1eb   :  { %v102_v63 = vstv %s95_s28  ;;  %s98_s15 = smul.f32 %s95_s28, %s68_s18 }
 0x1ec   :  { %v103_v1 = vmul.f32 %v102_v63, %v100_v62  ;;  %v104_v2 = vmul.f32 %v102_v63, %v101_v0  ;;  %v488_v62 = vpop.permute.xlu1 %487 }
 0x1ed   :  { %s99_s4 = ssub.f32 %s812_s29, %s98_s15 }
 0x1ef   :  { %v105_v3 = vstv %s99_s4 }
 0x1f0   :  { %v106_v4 = vadd.f32 %v105_v3, %v103_v1  ;;  %v107_v5 = vadd.f32 %v105_v3, %v104_v2  ;;  %v493_v63 = vpop.permute.xlu1 %492 }
 0x1f2   :  { %667 = vmatprep.mubr.msk.f32.mxu0 %vm158_vm2, %v107_v5 }
 0x1f3   :  { %234 = vmatmul.mubr.f32.vlgmr.msra.gmra.mrb[0].mxu0 %v106_v4 }
 0x1f4   :  { %693 = vmatprep.mubr.msk.f32.mxu0 %vm379_vm4, %v351_v25 }
 0x2c6   :  { %v235_v18 = vpop.f32.mrb[0].mxu0 }
 0x2c7   :  { %v236_v19 = vadd.f32 %v235_v18, %v151_v16  ;;  %v237_v20 = vpop.f32.mrb[1].mxu0 }
 0x2c8   :  { %v238_v21 = vadd.f32 %v237_v20, %v155_v17 }
 0x2c9   :  { %v240_v24 = vmax.f32 %v236_v19, 0.0 }
 0x2ca   :  { %v241_v23 = vmax.f32 %v238_v21, 0.0 }
 0x2cc   :  { %669 = vmatprep.mubr.msk.f32.mxu1 %vm276_vm3, %v241_v23 }
 0x2cd   :  { %345 = vmatmul.mubr.f32.vlgmr.msra.gmra.mrb[0].mxu1 %v240_v24 }
 0x3a0   :  { %v346_v35 = vpop.f32.mrb[0].mxu1 }
 0x3a1   :  { %v347_v36 = vadd.f32 %v668_v34, %v346_v35  ;;  %v348_v37 = vpop.f32.mrb[1].mxu1 }
 0x3a3   :  { %v350_v38 = vmax.f32 %v347_v36, 0.0 }
 0x3a5   :  { %691 = vmatprep.subr.mxu0 %v350_v38 }
 0x3a6   :  { %692 = vmatpush3.msra.mxu0 %v350_v38 }
 0x3a7   :  { %694 = vmatmul.mubr.msk.f32.vlgmr.msra.gmra.mrb[2].mxu0 %vm379_vm4, %v352_v39 }
 0x3a8   :  { %696 = vmatprep.mubr.msk.f32.mxu0 %vm379_vm4, %v353_v40 }
 0x3ab   :  { %697 = vmatmul.mubr.msk.f32.gmra.mrb[4].mxu0 %vm379_vm4, %v354_v41 }
 0x3ac   :  { %707 = vmatprep.mubr.msk.f32.mxu0 %vm495_vm5, %v481_v42 }
 0x47a   :  { %v695_v45 = vpop.f32.mrb[2].mxu0 }
 0x47b   :  { %v464_v46 = vadd.f32 %v695_v45, %v367_v44  ;;  %v458_v47 = vpop.f32.mrb[3].mxu0 }
 0x47c   :  { %v459_v48 = vadd.f32 %v458_v47, %v362_v43 }
 0x47d   :  { %v478_v49 = vmax.f32 %v464_v46, 0.0 }
 0x47e   :  { %v477_v52 = vmax.f32 %v459_v48, 0.0  ;;  %v698_v53 = vpop.f32.mrb[4].mxu0 }
 0x47f   :  { %v474_v54 = vadd.f32 %v698_v53, %v377_v51  ;;  %v468_v55 = vpop.f32.mrb[5].mxu0 }
 0x480   :  { %v792_v56 = vpack.c.bf16 %v478_v49, %v477_v52  ;;  %v469_v57 = vadd.f32 %v468_v55, %v372_v50 }
 0x481   :  { %v480_v58 = vmax.f32 %v474_v54, 0.0 }
 0x482   :  { %v479_v59 = vmax.f32 %v469_v57, 0.0  ;;  %793 = vmatprep.subr.bf16.mxu0 %v792_v56 }
 0x483   :  { %795 = vmatpush3.bf16.msra.mxu0 %v792_v56 }
 0x484   :  { %v796_v60 = vpack.c.bf16 %v480_v58, %v479_v59 }
 0x486   :  { %797 = vmatprep.subr.bf16.mxu0 %v796_v60 }
 0x487   :  { %799 = vmatpush3.bf16.msra.mxu0 %v796_v60 }
 0x488   :  { %800 = vmatprep.subr.bf16.mxu0 %v821_v22  ;;  %v584_v22 = vpop.permute.xlu1 %583 }
 0x48a   :  { %708 = vmatmul.mubr.msk.f32.vlgmr.msra.gmra.mrb[6].mxu0 %vm495_vm5, %v482_v61 }
 0x48b   :  { %714 = vmatprep.mubr.msk.f32.mxu0 %vm824_vm6, %v822_v10 }
 0x55d   :  { %v709_v0 = vpop.f32.mrb[6].mxu0 }
 0x55e   :  { %v574_v1 = vadd.f32 %v709_v0, %v493_v63  ;;  %v568_v2 = vpop.f32.mrb[7].mxu0 }
 0x55f   :  { %v569_v3 = vadd.f32 %v568_v2, %v488_v62 }
 0x560   :  { %v578_v4 = vmax.f32 %v574_v1, 0.0 }
 0x561   :  { %v577_v5 = vmax.f32 %v569_v3, 0.0 }
 0x563   :  { %v801_v6 = vpack.c.bf16 %v578_v4, %v577_v5 }
 0x565   :  { %802 = vmatpush3.bf16.msra.mxu0 %v801_v6 }
 0x568   :  { %715 = vmatmul.mubr.msk.f32.vlgmr.msra.gmra.mrb[8].mxu0 %vm53_vm0, %v579_v7 }
 0x63b   :  { %v655_v8 = vpop.f32.mrb[8].mxu0 }
 0x63c   :  { %v656_v9 = vadd.f32 %v655_v8, %v584_v22  ;;  %v716_v10 = vpop.f32.mrb[9].mxu0 }
 0x63e   :  { %v659_v11 = vmax.f32 %v656_v9, 0.0 }
 0x640   :  { %660 = vst [vmem:[%s1212_s14] sm:$0xf] %v659_v11 }

</bundles_post_ra>
